<compile_context>
chip_gen: v6e
topology: v6e:2x2x1
jax: 0.10.0
libtpu: 0.0.40
codegen_flags: <defaults>
</compile_context>

<pallas_src>
import jax
import jax.numpy as jnp
from jax.experimental import pallas as pl
from jax.experimental.pallas import tpu as pltpu


def _weighted_cat_kernel(w_ref, inp_ref, mat1_ref, mat2_ref, out_ref):
    # Single conv weight scalar lives in SMEM as (1, 1); fold alpha=0.5 into it.
    s = 0.5 * w_ref[0, 0]
    inp = inp_ref[...]

    # Fused LHS on the VPU: 0.5*w*inp + mat2 (replaces v1 materialization + 2nd matmul LHS).
    lhs = s * inp + mat2_ref[...]

    # One MXU pass instead of two; the 0.5*inp residual is VPU work that hides under the
    # DMA / MXU drain (kernel body is deliberately not micro-optimized further: DMA-bound).
    out = 0.5 * inp + jnp.dot(lhs, mat1_ref[...], preferred_element_type=jnp.float32)

    out_ref[...] = out.astype(out_ref.dtype)


_VMEM_BUDGET = 48 * 1024 * 1024   # safe under v7x's 64 MiB physical VMEM; far under v5e/v6e's 128 MiB
_VMEM_SLACK = 2 * 1024 * 1024     # headroom for compiler scratch


def _round_up(x, m):
    return ((x + m - 1) // m) * m


def _choose_tm(M, K, itemsize=4):
    """Largest sublane-aligned M tile (<= 512) whose working set fits the VMEM budget."""
    resident = K * K * itemsize            # mat1, single-buffered (pl.Buffered(1))
    per_row = 6 * K * itemsize             # inp + mat2 + out, each double-buffered
    avail = _VMEM_BUDGET - _VMEM_SLACK - resident
    tm = avail // per_row if avail > 0 else 8
    tm = max(8, min(512, (tm // 8) * 8))
    tm = min(tm, _round_up(M, 8))          # small-M: a single sublane-aligned tile
    # v7x has 2 TensorCores sharing HBM: give the "parallel" grid axis >= 2 steps when M is
    # large enough that each half stays >= 128 rows (neutral on single-TC v5e/v6e).
    if tm >= M and M >= 256:
        tm = _round_up((M + 1) // 2, 8)
    return int(tm)


def weighted_cat(inp_nchw, mat1, mat2, conv_weight):
    """inp_nchw: (1, 1, M, K); mat1: (K, K); mat2: (M, K); conv_weight: (1, 1, 1, 1).

    Returns the (M, K) float32 result of the intended WeightedCat forward.
    """
    assert inp_nchw.shape[0] == 1 and inp_nchw.shape[1] == 1
    M, K = int(inp_nchw.shape[2]), int(inp_nchw.shape[3])
    assert mat1.shape == (K, K) and mat2.shape == (M, K)

    # Reshape of a contiguous array is free; only cast if the caller's dtype differs
    # (avoids an extra HBM pass on a bandwidth-bound op).
    inp2d = inp_nchw.reshape(M, K)
    if inp2d.dtype != jnp.float32:
        inp2d = inp2d.astype(jnp.float32)
    if mat1.dtype != jnp.float32:
        mat1 = mat1.astype(jnp.float32)
    if mat2.dtype != jnp.float32:
        mat2 = mat2.astype(jnp.float32)
    w_smem = conv_weight.reshape(1, 1).astype(jnp.float32)

    itemsize = 4
    TM = _choose_tm(M, K, itemsize)
    grid = (pl.cdiv(M, TM),)   # partial last M block handled by Pallas (garbage rows land
                               # only in discarded output rows; K is never padded)

    # TODO(synk): for very large K (K*K*4 approaching the VMEM budget) tile the N/K axes of
    # mat1 instead of keeping it fully resident (matters most on v7x's 64 MiB VMEM).

    cost = pl.CostEstimate(
        flops=2 * M * K * K + 4 * M * K,
        bytes_accessed=(4 * M * K + K * K) * itemsize,
        transcendentals=0,
    )

    def _mat1_spec(pipeline_mode):
        if pipeline_mode is None:
            return pl.BlockSpec((K, K), lambda i: (0, 0))
        return pl.BlockSpec((K, K), lambda i: (0, 0), pipeline_mode=pipeline_mode)

    def _run(mat1_pipeline_mode):
        return pl.pallas_call(
            _weighted_cat_kernel,
            out_shape=jax.ShapeDtypeStruct((M, K), jnp.float32),
            grid=grid,
            in_specs=[
                pl.BlockSpec(memory_space=pltpu.MemorySpace.SMEM),   # conv weight scalar
                pl.BlockSpec((TM, K), lambda i: (i, 0)),             # inp tile
                _mat1_spec(mat1_pipeline_mode),                      # mat1: resident across grid
                pl.BlockSpec((TM, K), lambda i: (i, 0)),             # mat2 tile
            ],
            out_specs=pl.BlockSpec((TM, K), lambda i: (i, 0)),
            compiler_params=pltpu.CompilerParams(
                dimension_semantics=("parallel",),                   # megacore on v7x
                vmem_limit_bytes=_VMEM_BUDGET,
            ),
            cost_estimate=cost,
        )(w_smem, inp2d, mat1, mat2)

    try:
        # mat1's block index never changes: single-buffer it to halve its VMEM footprint.
        out = _run(pl.Buffered(1))
    except Exception:
        # Fallback if this jax/libtpu rejects pipeline_mode on BlockSpec: default buffering.
        out = _run(None)
    return out


def reference(inp_nchw, mat1, mat2, conv_weight):
    """Pure-JAX reference of the intended forward (unfused form)."""
    M, K = inp_nchw.shape[2], inp_nchw.shape[3]
    inp = inp_nchw.reshape(M, K)
    w = conv_weight.reshape(())
    v1 = w * inp
    v2 = 0.5 * inp + 0.5 * (v1 @ mat1)
    v3 = v2 + mat2 @ mat1
    return v3


if __name__ == "__main__":
    key = jax.random.PRNGKey(0)

    # Case 1: multi-tile M, lane-dense K (2-step "parallel" grid, resident mat1).
    # Case 2: M not a multiple of 8 (exercises the partial-last-block path, no padding pass).
    # Case 3: small ragged shapes (K < 128, masked stores; single tile).
    cases = [(256, 128), (100, 96), (40, 64)]

    ok = True
    for M, K in cases:
        key, k_inp, k_m1, k_m2, k_w = jax.random.split(key, 5)
        inp_nchw = jax.random.normal(k_inp, (1, 1, M, K), dtype=jnp.float32)
        mat1 = jax.random.normal(k_m1, (K, K), dtype=jnp.float32)
        mat2 = jax.random.normal(k_m2, (M, K), dtype=jnp.float32)
        # Conv2d(1, 1, 1, bias=False) weight, shape (out_ch, in_ch, kH, kW) = (1, 1, 1, 1)
        conv_weight = jax.random.normal(k_w, (1, 1, 1, 1), dtype=jnp.float32)

        out = jax.block_until_ready(weighted_cat(inp_nchw, mat1, mat2, conv_weight))
        ref = reference(inp_nchw, mat1, mat2, conv_weight)

        ok &= out.shape == (M, K)
        ok &= bool(jnp.allclose(out, ref, atol=1e-4, rtol=1e-4))

    assert ok, "mismatch vs reference"
    print("KERNEL_OK")
</pallas_src>

<mosaic_0001>
module attributes {stable_mosaic.version = 11 : i64} {
  func.func @_weighted_cat_kernel(%arg0: i32, %arg1: memref<1x1xf32, #tpu.memory_space<smem>>, %arg2: memref<128x128xf32, #tpu.memory_space<vmem>>, %arg3: memref<128x128xf32, #tpu.memory_space<vmem>>, %arg4: memref<128x128xf32, #tpu.memory_space<vmem>>, %arg5: memref<128x128xf32, #tpu.memory_space<vmem>>) attributes {dimension_semantics = [#tpu.dimension_semantics<parallel>], iteration_bounds = array<i64: 2>, scalar_prefetch = 0 : i64, scratch_operands = 0 : i64, tpu.core_type = #tpu.core_type<tc>, window_params = [{transform_indices = @transform_0, window_bounds = array<i64: 1, 1>}, {transform_indices = @transform_1, window_bounds = array<i64: 128, 128>}, {pipeline_mode = #tpu.pipeline_mode<synchronous>, transform_indices = @transform_2, window_bounds = array<i64: 128, 128>}, {transform_indices = @transform_3, window_bounds = array<i64: 128, 128>}, {transform_indices = @transform_4, window_bounds = array<i64: 128, 128>}]} {
    %c0 = arith.constant 0 : index
    %c0_0 = arith.constant 0 : index
    %0 = memref.load %arg1[%c0, %c0_0] : memref<1x1xf32, #tpu.memory_space<smem>>
    %cst = arith.constant 5.000000e-01 : f32
    %1 = arith.mulf %cst, %0 : f32
    %c0_1 = arith.constant 0 : index
    %c0_2 = arith.constant 0 : index
    %2 = vector.load %arg2[%c0_1, %c0_2] : memref<128x128xf32, #tpu.memory_space<vmem>>, vector<128x128xf32>
    %3 = vector.broadcast %1 : f32 to vector<128x128xf32>
    %4 = arith.mulf %3, %2 : vector<128x128xf32>
    %c0_3 = arith.constant 0 : index
    %c0_4 = arith.constant 0 : index
    %5 = vector.load %arg4[%c0_3, %c0_4] : memref<128x128xf32, #tpu.memory_space<vmem>>, vector<128x128xf32>
    %6 = arith.addf %4, %5 : vector<128x128xf32>
    %cst_5 = arith.constant 5.000000e-01 : f32
    %7 = vector.broadcast %cst_5 : f32 to vector<128x128xf32>
    %8 = arith.mulf %7, %2 : vector<128x128xf32>
    %c0_6 = arith.constant 0 : index
    %c0_7 = arith.constant 0 : index
    %9 = vector.load %arg3[%c0_6, %c0_7] : memref<128x128xf32, #tpu.memory_space<vmem>>, vector<128x128xf32>
    %cst_8 = arith.constant dense<0.000000e+00> : vector<128x128xf32>
    %10 = tpu.matmul %6, %9, %cst_8 {dimension_numbers = #tpu.dot_dimension_numbers<[1], [0], [0], [1], [0, 0, 1, 1], [], []>} : vector<128x128xf32>, vector<128x128xf32>, vector<128x128xf32> -> vector<128x128xf32>
    %11 = arith.addf %8, %10 : vector<128x128xf32>
    %c0_9 = arith.constant 0 : index
    %c0_10 = arith.constant 0 : index
    %12 = vector.load %arg5[%c0_9, %c0_10] : memref<128x128xf32, #tpu.memory_space<vmem>>, vector<128x128xf32>
    tpu.vector_store %arg5[%c0_9, %c0_10], %11 {strides = array<i32>} : memref<128x128xf32, #tpu.memory_space<vmem>>, vector<128x128xf32>,
    return
  }
  func.func @transform_0(%arg0: i32) -> (i32, i32) {
    %c0_i32 = arith.constant 0 : i32
    %c0_i32_0 = arith.constant 0 : i32
    %c0_i32_1 = arith.constant 0 : i32
    return %c0_i32, %c0_i32_0 : i32, i32
  }
  func.func @transform_1(%arg0: i32) -> (i32, i32) {
    %c0_i32 = arith.constant 0 : i32
    %c0_i32_0 = arith.constant 0 : i32
    return %arg0, %c0_i32 : i32, i32
  }
  func.func @transform_2(%arg0: i32) -> (i32, i32) {
    %c0_i32 = arith.constant 0 : i32
    %c0_i32_0 = arith.constant 0 : i32
    %c0_i32_1 = arith.constant 0 : i32
    return %c0_i32, %c0_i32_0 : i32, i32
  }
  func.func @transform_3(%arg0: i32) -> (i32, i32) {
    %c0_i32 = arith.constant 0 : i32
    %c0_i32_0 = arith.constant 0 : i32
    return %arg0, %c0_i32 : i32, i32
  }
  func.func @transform_4(%arg0: i32) -> (i32, i32) {
    %c0_i32 = arith.constant 0 : i32
    %c0_i32_0 = arith.constant 0 : i32
    return %arg0, %c0_i32 : i32, i32
  }
}

module attributes {stable_mosaic.version = 11 : i64} {
  func.func @_weighted_cat_kernel(%arg0: i32, %arg1: memref<1x1xf32, #tpu.memory_space<smem>>, %arg2: memref<128x128xf32, #tpu.memory_space<vmem>>, %arg3: memref<128x128xf32, #tpu.memory_space<vmem>>, %arg4: memref<128x128xf32, #tpu.memory_space<vmem>>, %arg5: memref<128x128xf32, #tpu.memory_space<vmem>>) attributes {dimension_semantics = [#tpu.dimension_semantics<parallel>], iteration_bounds = array<i64: 2>, scalar_prefetch = 0 : i64, scratch_operands = 0 : i64, tpu.core_type = #tpu.core_type<tc>, window_params = [{transform_indices = @transform_0, window_bounds = array<i64: 1, 1>}, {transform_indices = @transform_1, window_bounds = array<i64: 128, 128>}, {pipeline_mode = #tpu.pipeline_mode<synchronous>, transform_indices = @transform_2, window_bounds = array<i64: 128, 128>}, {transform_indices = @transform_3, window_bounds = array<i64: 128, 128>}, {transform_indices = @transform_4, window_bounds = array<i64: 128, 128>}]} {
    %c0 = arith.constant 0 : index
    %c0_0 = arith.constant 0 : index
    %0 = memref.load %arg1[%c0, %c0_0] : memref<1x1xf32, #tpu.memory_space<smem>>
    %cst = arith.constant 5.000000e-01 : f32
    %1 = arith.mulf %cst, %0 : f32
    %c0_1 = arith.constant 0 : index
    %c0_2 = arith.constant 0 : index
    %2 = vector.load %arg2[%c0_1, %c0_2] : memref<128x128xf32, #tpu.memory_space<vmem>>, vector<128x128xf32>
    %3 = vector.broadcast %1 : f32 to vector<128x128xf32>
    %4 = arith.mulf %3, %2 : vector<128x128xf32>
    %c0_3 = arith.constant 0 : index
    %c0_4 = arith.constant 0 : index
    %5 = vector.load %arg4[%c0_3, %c0_4] : memref<128x128xf32, #tpu.memory_space<vmem>>, vector<128x128xf32>
    %6 = arith.addf %4, %5 : vector<128x128xf32>
    %cst_5 = arith.constant 5.000000e-01 : f32
    %7 = vector.broadcast %cst_5 : f32 to vector<128x128xf32>
    %8 = arith.mulf %7, %2 : vector<128x128xf32>
    %c0_6 = arith.constant 0 : index
    %c0_7 = arith.constant 0 : index
    %9 = vector.load %arg3[%c0_6, %c0_7] : memref<128x128xf32, #tpu.memory_space<vmem>>, vector<128x128xf32>
    %cst_8 = arith.constant dense<0.000000e+00> : vector<128x128xf32>
    %10 = tpu.matmul %6, %9, %cst_8 {dimension_numbers = #tpu.dot_dimension_numbers<[1], [0], [0], [1], [0, 0, 1, 1], [], []>} : vector<128x128xf32>, vector<128x128xf32>, vector<128x128xf32> -> vector<128x128xf32>
    %11 = arith.addf %8, %10 : vector<128x128xf32>
    %c0_9 = arith.constant 0 : index
    %c0_10 = arith.constant 0 : index
    %12 = vector.load %arg5[%c0_9, %c0_10] : memref<128x128xf32, #tpu.memory_space<vmem>>, vector<128x128xf32>
    tpu.vector_store %arg5[%c0_9, %c0_10], %11 {strides = array<i32>} : memref<128x128xf32, #tpu.memory_space<vmem>>, vector<128x128xf32>,
    return
  }
  func.func @transform_0(%arg0: i32) -> (i32, i32) {
    %c0_i32 = arith.constant 0 : i32
    %c0_i32_0 = arith.constant 0 : i32
    %c0_i32_1 = arith.constant 0 : i32
    return %c0_i32, %c0_i32_0 : i32, i32
  }
  func.func @transform_1(%arg0: i32) -> (i32, i32) {
    %c0_i32 = arith.constant 0 : i32
    %c0_i32_0 = arith.constant 0 : i32
    return %arg0, %c0_i32 : i32, i32
  }
  func.func @transform_2(%arg0: i32) -> (i32, i32) {
    %c0_i32 = arith.constant 0 : i32
    %c0_i32_0 = arith.constant 0 : i32
    %c0_i32_1 = arith.constant 0 : i32
    return %c0_i32, %c0_i32_0 : i32, i32
  }
  func.func @transform_3(%arg0: i32) -> (i32, i32) {
    %c0_i32 = arith.constant 0 : i32
    %c0_i32_0 = arith.constant 0 : i32
    return %arg0, %c0_i32 : i32, i32
  }
  func.func @transform_4(%arg0: i32) -> (i32, i32) {
    %c0_i32 = arith.constant 0 : i32
    %c0_i32_0 = arith.constant 0 : i32
    return %arg0, %c0_i32 : i32, i32
  }
}

</mosaic_0001>

<bundles_post_ra>
// kernel: tpu_custom_call.1
= control target key start
LH: loop header
LB: loop body
LE: loop exit
PB: predicated region body
PF: predicated region fallthrough
CT: control target
= control target key end

     0   :  { %s1449_s0 = inlined_call_operand.<no memory space> [shape: f32[1,1], index: 0, kind: input, shape index: {}]   ;;  %s1450_s1 = inlined_call_operand.hbm [shape: f32[256,128], index: 1, kind: input, shape index: {}]   ;;  %s1451_s2 = inlined_call_operand.hbm [shape: f32[128,128], index: 2, kind: input, shape index: {}]   ;;  %s1452_s3 = inlined_call_operand.hbm [shape: f32[256,128], index: 3, kind: input, shape index: {}]   ;;  %s1453_s4 = inlined_call_operand.hbm [shape: f32[256,128], index: 4, kind: output, shape index: {}]  }
   0x1   :  { %9 = sst [smem:[#allocation2]] %s1449_s0 }
   0x2   :  { %10 = vsyncpa [#allocation4], 0 }
   0x3   :  { %12 = vsyncpa [#allocation4 + $0x1], 0 }
   0x4   :  { %13 = vsyncpa [#allocation7], 0 }
   0x5   :  { %14 = vsyncpa [#allocation5], 0 }
   0x6   :  { %16 = vsyncpa [#allocation5 + $0x1], 0  ;;  %s1066_s17 = smov 0   ;;  %s1068_s18 = smov 0  }
   0x7   :  { %s1070_s19 = smov 0   ;;  %s1072_s20 = smov 0  }
   0x8 LB: > { %s1087_s0 = sadd.s32 1, %s1028_s20   ;;  %s50_s21 = sadd.s32 1, %s1024_s19  ;;  %s1028_s20 = sphi %s1072_s20, %s1473_s20   ;;  %s1024_s19 = sphi %s1070_s19, %s1472_s19   ;;  %s1020_s18 = sphi %s1068_s18, %s1471_s18   ;;  %s1016_s17 = sphi %s1066_s17, %s1470_s17  }
   0x9   : > { %s47_s22 = ssub.s32 %s1028_s20, %s1087_s0  ;;  %p57_p0 = scmp.ne.s32.totalorder %s1024_s19, %s1020_s18 }
   0xa   : > { %p48_p1 = scmp.eq.s32.totalorder %s47_s22, 0  ;;  %p58_p2 = scmp.eq.s32.totalorder %s1028_s20, 0 }
   0xb   : > { %p834_p5 = scmp.lt.s32.totalorder %s1028_s20, 2  ;;  %s176_s24 = sand.u32 1, %s1028_s20  }
   0xc   : > { %s1096_s23 = scalar_select %p48_p1, %s1024_s19, %s50_s21  }
   0xd   : > { %p59_p3 = por %p58_p2, %p57_p0  ;;  %s178_s25 = sand.u32 1, %s1024_s19  }
   0xe   : > { %s1105_s26 = sshll.u32 %s178_s25, 7  ;;  %s685_s27 = sshll.u32 %s1028_s20, 11 }
   0xf   : > { %s1113_s30 = scalar_lea.hbm %s1450_s1, %s685_s27  ;;  %s180_s5 = scalar_lea.vmem [#allocation3], %s1105_s26 }
  0x10   : > { %s187_s6 = sshll.u32 %s180_s5, 4  ;;  %p1116_p6 = pnand %p834_p5, %p59_p3  ;;  %s1120_s6 = int_to_ptr.vmem [resolvable:$true] %s187_s6 }
  0x11   : > { %s1122_s8 = scalar_lea.sflag [#allocation4], %s176_s24  ;;  %s874_s9 = scalar_lea.hbm %s1113_s30, 2048 }
  0x12   : > { %p875_p7 = scmp.ne.s32.totalorder %s1113_s30, %s874_s9  ;;  %p876_p8 = pneg %p1116_p6 }
  0x13   : > { %s879_s12 = scalar_lea.hbm %s1450_s1, 4096  ;;  %p880_p11 = scmp.lt.s32.totalorder %s1113_s30, %s1450_s1 }
  0x14   : > { %p877_p9 = pnand %p876_p8, %p875_p7  ;;  %p881_p12 = scmp.lt.s32.totalorder %s879_s12, %s874_s9 }
  0x16   : > { %p878_p10 = pneg %p877_p9  ;;  %p882_p13 = por %p881_p12, %p880_p11 }
  0x18   : > { %p883_p1 = pnand %p882_p13, %p878_p10 }
  0x1a   : > { %886 = shalt.err (!%p883_p1)
}
  0x1b   : > { %s887_s15 = scalar_lea.vmem %s1120_s6, 2048  ;;  %s1030_s16 = smov [#allocation3]  }
  0x1c   : > { %p888_p2 = scmp.ne.s32.totalorder %s1120_s6, %s887_s15  ;;  %s892_s21 = sshll.u32 %s1030_s16, 4  ;;  %s893_s21 = int_to_ptr.vmem [resolvable:$false] %s892_s21 }
  0x1d   : > { %s894_s22 = scalar_lea.vmem %s893_s21, 4096  ;;  %p895_p7 = scmp.lt.s32.totalorder %s1120_s6, %s893_s21 }
  0x1e   : > { %p890_p3 = pnand %p888_p2, %p876_p8  ;;  %p896_p9 = scmp.lt.s32.totalorder %s894_s22, %s887_s15 }
  0x20   : > { %p891_p5 = pneg %p890_p3  ;;  %p897_p4 = por %p896_p9, %p895_p7 }
  0x22   : > { %p898_p11 = pnand %p897_p4, %p891_p5 }
  0x24   : > { %901 = shalt.err (!%p898_p11)
}
  0x25   : > { %s1031_s24 = smov 128   ;;  %s1032_s25 = smov 8  }
  0x26   : > { %825 = dma.hbm_to_vmem [thread:$0]  (!%p1116_p6), %s1113_s30, 2048, %s1120_s6, %s1122_s8, %s1031_s24, %s1031_s24, %s1032_s25  }
  0x27   : > { %s201_s28 = scalar_lea.vmem [#allocation8], %s1105_s26  ;;  %s1154_s5 = sadd.s32 4294967295, %s1028_s20  }
  0x28   : > { %s208_s29 = sshll.u32 %s201_s28, 4  ;;  %s665_s9 = sadd.s32 4294967294, %s1028_s20   ;;  %s1187_s29 = int_to_ptr.vmem [resolvable:$true] %s208_s29 }
  0x29   : > { %p63_p4 = scmp.ne.s32.totalorder %s1020_s18, %s1016_s17  ;;  %p1454_p10 = scmp.eq.s32.totalorder %s1154_s5, 0 }
  0x2a   : > { %p134_p12 = scmp.eq.s32.totalorder %s1154_s5, 1  ;;  %p140_p13 = scmp.eq.s32.totalorder %s665_s9, 1 }
  0x2b   : > { %p1163_p1 = por %p1454_p10, %p63_p4  ;;  %p666_p2 = scmp.ge.s32.totalorder %s1028_s20, 1 }
  0x2c   : > { %p1171_p3 = por %p134_p12, %p57_p0  ;;  %p1175_p5 = por %p140_p13, %p63_p4 }
  0x2d   : > { %s1458_s10 = scalar_select %p1163_p1, 1, 0 }
  0x2e   : > { %s1459_s26 = scalar_select %p1171_p3, 1, 0 }
  0x2f   : > { %s1460_s30 = scalar_select %p1175_p5, 1, 0 }
  0x30   : > { %p147_p7 = scmp.lt.s32.totalorder %s1028_s20, 3  ;;  %s1185_s12 = scalar_lea.hbm %s1452_s3, %s685_s27 }
  0x31   : > { %s1033_s14 = smov [#allocation6]   ;;  %s902_s16 = scalar_lea.hbm %s1185_s12, 2048 }
  0x32   : > { %p1189_p0 = pnand %p666_p2, %p147_p7  ;;  %s1193_s15 = sshll.u32 %s1033_s14, 4  ;;  %s163_s15 = int_to_ptr.vmem [resolvable:$true] %s1193_s15 }
  0x33   : > { %p903_p11 = scmp.ne.s32.totalorder %s1185_s12, %s902_s16  ;;  %s907_s22 = scalar_lea.hbm %s1452_s3, 4096 }
  0x34   : > { %p908_p13 = scmp.lt.s32.totalorder %s1185_s12, %s1452_s3  ;;  %p909_p2 = scmp.lt.s32.totalorder %s907_s22, %s902_s16 }
  0x35   : > { %p905_p4 = pnand %p903_p11, %p876_p8 }
  0x36   : > { %p910_p7 = por %p909_p2, %p908_p13 }
  0x37   : > { %p906_p12 = pneg %p905_p4 }
  0x39   : > { %p911_p10 = pnand %p910_p7, %p906_p12 }
  0x3b   : > { %914 = shalt.err (!%p911_p10)
}
  0x3c   : > { %s915_s6 = scalar_lea.vmem %s1187_s29, 2048  ;;  %s1034_s11 = smov [#allocation8]  }
  0x3d   : > { %p916_p9 = scmp.ne.s32.totalorder %s1187_s29, %s915_s6  ;;  %s920_s14 = sshll.u32 %s1034_s11, 4  ;;  %s921_s14 = int_to_ptr.vmem [resolvable:$false] %s920_s14 }
  0x3e   : > { %s922_s27 = scalar_lea.vmem %s921_s14, 4096  ;;  %p923_p5 = scmp.lt.s32.totalorder %s1187_s29, %s921_s14 }
  0x3f   : > { %p918_p11 = pnand %p916_p9, %p876_p8  ;;  %p924_p3 = scmp.lt.s32.totalorder %s922_s27, %s915_s6 }
  0x41   : > { %p919_p4 = pneg %p918_p11  ;;  %p925_p1 = por %p924_p3, %p923_p5 }
  0x43   : > { %p926_p13 = pnand %p925_p1, %p919_p4 }
  0x45   : > { %929 = shalt.err (!%p926_p13)
}
  0x46   : > { %828 = dma.hbm_to_vmem [thread:$0]  (!%p1116_p6), %s1185_s12, 2048, %s1187_s29, %s1122_s8, %s1031_s24, %s1031_s24, %s1032_s25  }
  0x47   : > { %p1462_p8 = scmp.eq.s32.totalorder %s1154_s5, 0  ;;  %p1463_p10 = pneg %p1189_p0 }
  0x48   : > { %s941_s16 = scalar_lea.vmem %s163_s15, 2048  ;;  %p949_p2 = scmp.lt.s32.totalorder %s163_s15, %s163_s15 }
  0x49   : > { %p819_p9 = pnand %p1463_p10, %p1462_p8  ;;  %p942_p1 = scmp.ne.s32.totalorder %s163_s15, %s941_s16 }
  0x4a   : > { %p950_p7 = scmp.lt.s32.totalorder %s941_s16, %s941_s16 }
  0x4b   : > { %p932_p3 = pneg %p819_p9 }
  0x4c   : > { %p951_p11 = por %p950_p7, %p949_p2 }
  0x4d   : > { %p944_p5 = pnand %p942_p1, %p932_p3 }
  0x4f   : > { %p945_p12 = pneg %p944_p5 }
  0x51   : > { %p952_p4 = pnand %p951_p11, %p945_p12 }
  0x53   : > { %955 = shalt.err (!%p952_p4)
}
  0x54   : > { %821 = dma.hbm_to_vmem [thread:$0]  (!%p819_p9), %s1451_s2, 2048, %s163_s15, [#allocation7], %s1031_s24, %s1031_s24, %s1032_s25  }
  0x55   : > { %220 = sbr.rel (%p1189_p0) target bundleno = 354 (0x162), region = 36  ;;  %s222_s29 = sand.u32 (!%p1189_p0), 1, %s1154_s5  }
  0x56   : > { %s224_s12 = sand.u32 (!%p1189_p0), 1, %s1020_s18   ;;  %s223_s22 = scalar_lea.sflag (!%p1189_p0), [#allocation4], %s222_s29 }
  0x57   : > { %s1241_s21 = sshll.u32 (!%p1189_p0), %s224_s12, 7  ;;  %p1464_p6 = scmp.ne.s32.totalorder (!%p1189_p0), %s1458_s10, 0 }
  0x58   : > { %s1244_s28 = scalar_lea.vmem (!%p1189_p0), [#allocation3], %s1241_s21 }
  0x5a   : > { %999 = dma.done.wait (%p1464_p6), %s223_s22, 2048  }
  0x5b   : > { %1001 = vsyncadd (%p1464_p6), %s223_s22, 4294965248  ;;  %p1465_p0 = scmp.eq.s32.totalorder %s1154_s5, 0 }
  0x5d   : > { %1003 = dma.done.wait (%p1465_p0), [#allocation7], 2048   ;;  %p1466_p13 = pmov %p1465_p0 }
  0x5e   : > { %s1255_s24 = scalar_lea.vmem [#allocation8], %s1241_s21 }
  0x5f   : > { %1005 = vsyncadd (%p1466_p13), [#allocation7], 4294965248 }
  0x60   : > { %1007 = dma.done.wait (%p1464_p6), %s223_s22, 2048  }
  0x61   : > { %1009 = vsyncadd (%p1464_p6), %s223_s22, 4294965248  ;;  %v370_v0 = vld [vmem:[#allocation6 + $0x78] sm:$0xff]  ;;  %v369_v1 = vld [vmem:[#allocation6 + $0x70] sm:$0xff]  ;;  %s1261_s25 = sld [smem:[#allocation2]]  ;;  %s1369_s13 = scalar_lea.vmem [#allocation9], %s1241_s21 }
  0x62   : > { %720 = vmatprep.subr.mxu0 %v370_v0  ;;  %776 = vmatprep.subr.mxu1 %v370_v0  ;;  %v368_v2 = vld [vmem:[#allocation6 + $0x68] sm:$0xff]  ;;  %v367_v3 = vld [vmem:[#allocation6 + $0x60] sm:$0xff]  ;;  %v366_v4 = vld [vmem:[#allocation6 + $0x58] sm:$0xff]  ;;  %s687_s15 = sshll.u32 %s1154_s5, 11  ;;  %s562_s9 = sshll.u32 %s1369_s13, 4  ;;  %s1400_s9 = int_to_ptr.vmem [resolvable:$true] %s562_s9 }
  0x63   : > { %721 = vmatpush3.msra.mxu0 %v370_v0  ;;  %792 = vmatpush3.msra.mxu1 %v370_v0  ;;  %v365_v5 = vld [vmem:[#allocation6 + $0x50] sm:$0xff]  ;;  %v364_v6 = vld [vmem:[#allocation6 + $0x48] sm:$0xff]  ;;  %v363_v7 = vld [vmem:[#allocation6 + $0x40] sm:$0xff]  ;;  %s1398_s14 = scalar_lea.hbm %s1453_s4, %s687_s15  ;;  %s1408_s5 = scalar_lea.sflag [#allocation5], %s224_s12 }
  0x64   : > { %722 = vmatprep.subr.mxu0 %v369_v1  ;;  %777 = vmatprep.subr.mxu1 %v369_v1  ;;  %v362_v8 = vld [vmem:[#allocation6 + $0x38] sm:$0xff]  ;;  %v361_v9 = vld [vmem:[#allocation6 + $0x30] sm:$0xff]  ;;  %v360_v10 = vld [vmem:[#allocation6 + $0x28] sm:$0xff]  ;;  %s956_s27 = scalar_lea.vmem %s1400_s9, 2048  ;;  %p1467_p10 = scmp.ne.s32.totalorder %s1459_s26, 0 }
  0x65   : > { %723 = vmatpush3.msra.mxu0 %v369_v1  ;;  %793 = vmatpush3.msra.mxu1 %v369_v1  ;;  %v359_v11 = vld [vmem:[#allocation6 + $0x20] sm:$0xff]  ;;  %v358_v14 = vld [vmem:[#allocation6 + $0x18] sm:$0xff]  ;;  %v1273_v16 = vld [vmem:[%s1244_s28 + $0x8] sm:$0xff]  ;;  %p957_p8 = scmp.ne.s32.totalorder %s1400_s9, %s956_s27  ;;  %s1035_s16 = smov [#allocation9]  }
  0x66   : > { %724 = vmatprep.subr.mxu0 %v368_v2  ;;  %778 = vmatprep.subr.mxu1 %v368_v2  ;;  %v1265_v12 = vld [vmem:[%s1244_s28] sm:$0xff]  ;;  %v1276_v17 = vld [vmem:[%s1244_s28 + $0x48] sm:$0xff]  ;;  %v357_v18 = vld [vmem:[#allocation6 + $0x10] sm:$0xff]  ;;  %s960_s7 = sshll.u32 %s1035_s16, 4  ;;  %s961_s7 = int_to_ptr.vmem [resolvable:$false] %s960_s7 }
  0x67   : > { %725 = vmatpush3.msra.mxu0 %v368_v2  ;;  %794 = vmatpush3.msra.mxu1 %v368_v2  ;;  %s273_s10 = smul.f32 0.5, %s1261_s25  ;;  %v1270_v15 = vld [vmem:[%s1244_s28 + $0x40] sm:$0xff]  ;;  %v1281_v20 = vld [vmem:[%s1244_s28 + $0x10] sm:$0xff]  ;;  %v356_v22 = vld [vmem:[#allocation6 + $0x8] sm:$0xff]  ;;  %p958_p9 = pnand %p957_p8, %p1467_p10 }
  0x68   : > { %726 = vmatprep.subr.mxu0 %v367_v3  ;;  %779 = vmatprep.subr.mxu1 %v367_v3  ;;  %v1284_v21 = vld [vmem:[%s1244_s28 + $0x50] sm:$0xff]  ;;  %v307_v23 = vld [vmem:[%s1255_s24] sm:$0xff]  ;;  %v308_v28 = vld [vmem:[%s1255_s24 + $0x8] sm:$0xff]  ;;  %s962_s8 = scalar_lea.vmem %s961_s7, 4096  ;;  %p963_p1 = scmp.lt.s32.totalorder %s1400_s9, %s961_s7 }
  0x69   : > { %727 = vmatpush3.msra.mxu0 %v367_v3  ;;  %795 = vmatpush3.msra.mxu1 %v367_v3  ;;  %v1267_v13 = vstv %s273_s10  ;;  %v355_v26 = vld [vmem:[#allocation6] sm:$0xff]  ;;  %v1296_v30 = vld [vmem:[%s1244_s28 + $0x18] sm:$0xff]  ;;  %v316_v31 = vld [vmem:[%s1255_s24 + $0x48] sm:$0xff]  ;;  %p959_p3 = pneg %p958_p9  ;;  %p964_p5 = scmp.lt.s32.totalorder %s962_s8, %s956_s27 }
  0x6a   : > { %728 = vmatprep.subr.mxu0 %v366_v4  ;;  %780 = vmatprep.subr.mxu1 %v366_v4  ;;  %v291_v19 = vmul.f32 %v1267_v13, %v1265_v12  ;;  %v299_v24 = vmul.f32 %v1267_v13, %v1270_v15  ;;  %v292_v25 = vmul.f32 %v1267_v13, %v1273_v16  ;;  %v315_v27 = vld [vmem:[%s1255_s24 + $0x40] sm:$0xff]  ;;  %v1304_v34 = vld [vmem:[%s1244_s28 + $0x58] sm:$0xff]  ;;  %v309_v37 = vld [vmem:[%s1255_s24 + $0x10] sm:$0xff] }
  0x6b   : > { %729 = vmatpush3.msra.mxu0 %v366_v4  ;;  %796 = vmatpush3.msra.mxu1 %v366_v4  ;;  %v300_v29 = vmul.f32 %v1267_v13, %v1276_v17  ;;  %v293_v32 = vmul.f32 %v1267_v13, %v1281_v20  ;;  %v301_v33 = vmul.f32 %v1267_v13, %v1284_v21  ;;  %v1307_v35 = vld [vmem:[%s1244_s28 + $0x20] sm:$0xff]  ;;  %v317_v38 = vld [vmem:[%s1255_s24 + $0x50] sm:$0xff]  ;;  %v310_v44 = vld [vmem:[%s1255_s24 + $0x18] sm:$0xff]  ;;  %p965_p12 = por %p964_p5, %p963_p1 }
  0x6c   : > { %730 = vmatprep.subr.mxu0 %v365_v5  ;;  %781 = vmatprep.subr.mxu1 %v365_v5  ;;  %v323_v36 = vadd.f32 %v307_v23, %v291_v19  ;;  %v1312_v39 = vld [vmem:[%s1244_s28 + $0x60] sm:$0xff]  ;;  %v331_v40 = vadd.f32 %v315_v27, %v299_v24  ;;  %v324_v41 = vadd.f32 %v308_v28, %v292_v25  ;;  %v1322_v47 = vld [vmem:[%s1244_s28 + $0x28] sm:$0xff]  ;;  %v318_v50 = vld [vmem:[%s1255_s24 + $0x58] sm:$0xff]  ;;  %v340_v24 = vmul.f32 0.5, %v1273_v16 }
  0x6d   : > { %731 = vmatpush3.msra.mxu0 %v365_v5  ;;  %797 = vmatpush3.msra.mxu1 %v365_v5  ;;  %v294_v42 = vmul.f32 %v1267_v13, %v1296_v30  ;;  %v332_v43 = vadd.f32 %v316_v31, %v300_v29  ;;  %v302_v45 = vmul.f32 %v1267_v13, %v1304_v34  ;;  %v311_v51 = vld [vmem:[%s1255_s24 + $0x20] sm:$0xff]  ;;  %v1329_v53 = vld [vmem:[%s1244_s28 + $0x68] sm:$0xff]  ;;  %v1333_v55 = vld [vmem:[%s1244_s28 + $0x30] sm:$0xff]  ;;  %v348_v25 = vmul.f32 0.5, %v1276_v17  ;;  %p966_p2 = pnand %p965_p12, %p959_p3 }
  0x6e   : > { %732 = vmatprep.subr.mxu0 %v364_v6  ;;  %782 = vmatprep.subr.mxu1 %v364_v6  ;;  %v295_v46 = vmul.f32 %v1267_v13, %v1307_v35  ;;  %v325_v48 = vadd.f32 %v309_v37, %v293_v32  ;;  %v333_v49 = vadd.f32 %v317_v38, %v301_v33  ;;  %v319_v54 = vld [vmem:[%s1255_s24 + $0x60] sm:$0xff]  ;;  %v1336_v56 = vld [vmem:[%s1244_s28 + $0x70] sm:$0xff]  ;;  %v312_v61 = vld [vmem:[%s1255_s24 + $0x28] sm:$0xff]  ;;  %v342_v32 = vmul.f32 0.5, %v1296_v30 }
  0x6f   : > { %733 = vmatpush3.msra.mxu0 %v364_v6  ;;  %798 = vmatpush3.msra.mxu1 %v364_v6  ;;  %v303_v52 = vmul.f32 %v1267_v13, %v1312_v39  ;;  %v326_v57 = vadd.f32 %v310_v44, %v294_v42  ;;  %v296_v58 = vmul.f32 %v1267_v13, %v1322_v47  ;;  %v320_v0 = vld [vmem:[%s1255_s24 + $0x68] sm:$0xff]  ;;  %v1349_v3 = vld [vmem:[%s1244_s28 + $0x38] sm:$0xff]  ;;  %v313_v5 = vld [vmem:[%s1255_s24 + $0x30] sm:$0xff]  ;;  %v350_v33 = vmul.f32 0.5, %v1304_v34 }
  0x70   : > { %734 = vmatprep.subr.mxu0 %v363_v7  ;;  %783 = vmatprep.subr.mxu1 %v363_v7  ;;  %v334_v59 = vadd.f32 %v318_v50, %v302_v45  ;;  %v327_v60 = vadd.f32 %v311_v51, %v295_v46  ;;  %v304_v62 = vmul.f32 %v1267_v13, %v1329_v53  ;;  %v1352_v4 = vld [vmem:[%s1244_s28 + $0x78] sm:$0xff]  ;;  %v321_v6 = vld [vmem:[%s1255_s24 + $0x70] sm:$0xff]  ;;  %v341_v16 = vmul.f32 0.5, %v1281_v20 }
  0x71   : > { %735 = vmatpush3.msra.mxu0 %v363_v7  ;;  %799 = vmatpush3.msra.mxu1 %v363_v7  ;;  %v335_v63 = vadd.f32 %v319_v54, %v303_v52  ;;  %v297_v1 = vmul.f32 %v1267_v13, %v1333_v55  ;;  %v305_v2 = vmul.f32 %v1267_v13, %v1336_v56  ;;  %v322_v19 = vld [vmem:[%s1255_s24 + $0x78] sm:$0xff]  ;;  %v349_v17 = vmul.f32 0.5, %v1284_v21 }
  0x72   : > { %736 = vmatprep.subr.mxu0 %v362_v8  ;;  %784 = vmatprep.subr.mxu1 %v362_v8  ;;  %v328_v7 = vadd.f32 %v312_v61, %v296_v58  ;;  %v352_v42 = vmul.f32 0.5, %v1329_v53  ;;  %v343_v45 = vmul.f32 0.5, %v1307_v35  ;;  %v351_v46 = vmul.f32 0.5, %v1312_v39 }
  0x73   : > { %737 = vmatpush3.msra.mxu0 %v362_v8  ;;  %800 = vmatpush3.msra.mxu1 %v362_v8  ;;  %v336_v8 = vadd.f32 %v320_v0, %v304_v62  ;;  %v346_v51 = vmul.f32 0.5, %v1349_v3  ;;  %v354_v52 = vmul.f32 0.5, %v1352_v4  ;;  %v353_v58 = vmul.f32 0.5, %v1336_v56 }
  0x74   : > { %738 = vmatprep.subr.mxu0 %v361_v9  ;;  %785 = vmatprep.subr.mxu1 %v361_v9 }
  0x75   : > { %739 = vmatpush3.msra.mxu0 %v361_v9  ;;  %801 = vmatpush3.msra.mxu1 %v361_v9  ;;  %v298_v9 = vmul.f32 %v1267_v13, %v1349_v3 }
  0x76   : > { %740 = vmatprep.subr.mxu0 %v360_v10  ;;  %786 = vmatprep.subr.mxu1 %v360_v10 }
  0x77   : > { %741 = vmatpush3.msra.mxu0 %v360_v10  ;;  %802 = vmatpush3.msra.mxu1 %v360_v10  ;;  %v306_v10 = vmul.f32 %v1267_v13, %v1352_v4  ;;  %v339_v13 = vmul.f32 0.5, %v1265_v12 }
  0x78   : > { %742 = vmatprep.subr.mxu0 %v359_v11  ;;  %787 = vmatprep.subr.mxu1 %v359_v11 }
  0x79   : > { %743 = vmatpush3.msra.mxu0 %v359_v11  ;;  %803 = vmatpush3.msra.mxu1 %v359_v11  ;;  %v329_v11 = vadd.f32 %v313_v5, %v297_v1  ;;  %v338_v23 = vadd.f32 %v322_v19, %v306_v10 }
  0x7a   : > { %744 = vmatprep.subr.mxu0 %v358_v14  ;;  %788 = vmatprep.subr.mxu1 %v358_v14 }
  0x7b   : > { %745 = vmatpush3.msra.mxu0 %v358_v14  ;;  %804 = vmatpush3.msra.mxu1 %v358_v14  ;;  %v337_v14 = vadd.f32 %v321_v6, %v305_v2 }
  0x7c   : > { %746 = vmatprep.subr.mxu0 %v357_v18  ;;  %789 = vmatprep.subr.mxu1 %v357_v18 }
  0x7d   : > { %747 = vmatpush3.msra.mxu0 %v357_v18  ;;  %805 = vmatpush3.msra.mxu1 %v357_v18  ;;  %v314_v18 = vld [vmem:[%s1255_s24 + $0x38] sm:$0xff] }
  0x7e   : > { %748 = vmatprep.subr.mxu0 %v356_v22  ;;  %790 = vmatprep.subr.mxu1 %v356_v22 }
  0x7f   : > { %749 = vmatpush3.msra.mxu0 %v356_v22  ;;  %806 = vmatpush3.msra.mxu1 %v356_v22  ;;  %v330_v22 = vadd.f32 %v314_v18, %v298_v9 }
  0x80   : > { %750 = vmatprep.subr.mxu0 %v355_v26  ;;  %791 = vmatprep.subr.mxu1 %v355_v26 }
  0x81   : > { %751 = vmatpush3.msra.mxu0 %v355_v26  ;;  %807 = vmatpush3.msra.mxu1 %v355_v26  ;;  %v347_v26 = vmul.f32 0.5, %v1270_v15 }
  0x82   : > { %752 = vmatprep.mubr.f32.mxu0 %v323_v36  ;;  %764 = vmatprep.mubr.f32.mxu1 %v331_v40 }
  0x83   : > { %753 = vmatmul.mubr.f32.vlgmr.msra.gmra.mxu0 %v324_v41  ;;  %765 = vmatmul.mubr.f32.vlgmr.msra.gmra.mxu1 %v332_v43  ;;  %v344_v41 = vmul.f32 0.5, %v1322_v47 }
  0x84   : > { %755 = vmatprep.mubr.f32.mxu0 %v325_v48  ;;  %767 = vmatprep.mubr.f32.mxu1 %v333_v49 }
  0x87   : > { %756 = vmatmul.mubr.f32.gmra.mxu0 %v326_v57  ;;  %768 = vmatmul.mubr.f32.gmra.mxu1 %v334_v59  ;;  %v345_v57 = vmul.f32 0.5, %v1333_v55 }
  0x88   : > { %758 = vmatprep.mubr.f32.mxu0 %v327_v60  ;;  %770 = vmatprep.mubr.f32.mxu1 %v335_v63 }
  0x8b   : > { %759 = vmatmul.mubr.f32.gmra.mxu0 %v328_v7  ;;  %771 = vmatmul.mubr.f32.gmra.mxu1 %v336_v8 }
  0x8c   : > { %761 = vmatprep.mubr.f32.mxu0 %v329_v11  ;;  %773 = vmatprep.mubr.f32.mxu1 %v337_v14 }
  0x8f   : > { %762 = vmatmul.mubr.f32.gmra.mxu0 %v330_v22  ;;  %774 = vmatmul.mubr.f32.gmra.mxu1 %v338_v23 }
 0x143   : > { %v754_v27 = vpop.f32.mrf.mxu0  ;;  %v766_v28 = vpop.f32.mrf.mxu1 }
 0x144   : > { %v517_v29 = vadd.f32 %v754_v27, %v340_v24  ;;  %v525_v31 = vadd.f32 %v766_v28, %v348_v25 }
 0x145   : > { %v437_v36 = vpop.f32.mrf.mxu0  ;;  %v477_v37 = vpop.f32.mrf.mxu1 }
 0x146   : > { %533 = vst [vmem:[%s1369_s13 + $0x8] sm:$0xff] %v517_v29  ;;  %541 = vst [vmem:[%s1369_s13 + $0x48] sm:$0xff] %v525_v31  ;;  %v516_v12 = vadd.f32 %v437_v36, %v339_v13  ;;  %v524_v15 = vadd.f32 %v477_v37, %v347_v26 }
 0x147   : > { %v757_v30 = vpop.f32.mrf.mxu0  ;;  %v769_v34 = vpop.f32.mrf.mxu1 }
 0x148   : > { %532 = vst [vmem:[%s1369_s13] sm:$0xff] %v516_v12  ;;  %540 = vst [vmem:[%s1369_s13 + $0x40] sm:$0xff] %v524_v15  ;;  %v519_v38 = vadd.f32 %v757_v30, %v342_v32  ;;  %v527_v40 = vadd.f32 %v769_v34, %v350_v33 }
 0x149   : > { %v447_v43 = vpop.f32.mrf.mxu0  ;;  %v487_v44 = vpop.f32.mrf.mxu1 }
 0x14a   : > { %535 = vst [vmem:[%s1369_s13 + $0x18] sm:$0xff] %v519_v38  ;;  %543 = vst [vmem:[%s1369_s13 + $0x58] sm:$0xff] %v527_v40  ;;  %v518_v20 = vadd.f32 %v447_v43, %v341_v16  ;;  %v526_v21 = vadd.f32 %v487_v44, %v349_v17 }
 0x14b   : > { %v760_v48 = vpop.f32.mrf.mxu0  ;;  %v772_v49 = vpop.f32.mrf.mxu1 }
 0x14c   : > { %534 = vst [vmem:[%s1369_s13 + $0x10] sm:$0xff] %v518_v20  ;;  %542 = vst [vmem:[%s1369_s13 + $0x50] sm:$0xff] %v526_v21  ;;  %v521_v47 = vadd.f32 %v760_v48, %v344_v41  ;;  %v529_v50 = vadd.f32 %v772_v49, %v352_v42 }
 0x14d   : > { %v457_v53 = vpop.f32.mrf.mxu0  ;;  %v497_v54 = vpop.f32.mrf.mxu1 }
 0x14e   : > { %537 = vst [vmem:[%s1369_s13 + $0x28] sm:$0xff] %v521_v47  ;;  %545 = vst [vmem:[%s1369_s13 + $0x68] sm:$0xff] %v529_v50  ;;  %v520_v35 = vadd.f32 %v457_v53, %v343_v45  ;;  %v528_v39 = vadd.f32 %v497_v54, %v351_v46 }
 0x14f   : > { %v763_v59 = vpop.f32.mrf.mxu0  ;;  %v775_v60 = vpop.f32.mrf.mxu1 }
 0x150   : > { %536 = vst [vmem:[%s1369_s13 + $0x20] sm:$0xff] %v520_v35  ;;  %544 = vst [vmem:[%s1369_s13 + $0x60] sm:$0xff] %v528_v39  ;;  %v523_v61 = vadd.f32 %v763_v59, %v346_v51  ;;  %v531_v62 = vadd.f32 %v775_v60, %v354_v52 }
 0x151   : > { %v467_v63 = vpop.f32.mrf.mxu0  ;;  %v507_v0 = vpop.f32.mrf.mxu1 }
 0x152   : > { %539 = vst [vmem:[%s1369_s13 + $0x38] sm:$0xff] %v523_v61  ;;  %547 = vst [vmem:[%s1369_s13 + $0x78] sm:$0xff] %v531_v62  ;;  %v522_v55 = vadd.f32 %v467_v63, %v345_v57  ;;  %v530_v56 = vadd.f32 %v507_v0, %v353_v58 }
 0x154   : > { %538 = vst [vmem:[%s1369_s13 + $0x30] sm:$0xff] %v522_v55  ;;  %546 = vst [vmem:[%s1369_s13 + $0x70] sm:$0xff] %v530_v56 }
 0x155   : > { %969 = shalt.err (!%p966_p2)
}
 0x156   : > { %s970_s29 = scalar_lea.hbm %s1398_s14, 2048  ;;  %s974_s22 = scalar_lea.hbm %s1453_s4, 4096 }
 0x157   : > { %p971_p7 = scmp.ne.s32.totalorder %s1398_s14, %s970_s29  ;;  %p975_p6 = scmp.lt.s32.totalorder %s1398_s14, %s1453_s4 }
 0x158   : > { %p976_p0 = scmp.lt.s32.totalorder %s974_s22, %s970_s29 }
 0x159   : > { %p972_p11 = pnand %p971_p7, %p1467_p10 }
 0x15a   : > { %p977_p13 = por %p976_p0, %p975_p6 }
 0x15b   : > { %p973_p4 = pneg %p972_p11 }
 0x15d   : > { %p978_p8 = pnand %p977_p13, %p973_p4 }
 0x15f   : > { %981 = shalt.err (!%p978_p8)
}
 0x160   : > { %s1036_s25 = smov 128   ;;  %s1037_s10 = smov 8  }
 0x161   : > { %816 = dma.vmem_to_hbm [thread:$0]  (%p1467_p10), %s1400_s9, 2048, %s1398_s14, %s1408_s5, %s1036_s25, %s1036_s25, %s1037_s10  }
 0x162 PF: > { %s577_s13 = sand.u32 1, %s1016_s17   ;;  %p1468_p9 = scmp.ne.s32.totalorder %s1460_s30, 0 }
 0x163   : > { %p1469_p3 = scmp.ge.s32.totalorder %s1028_s20, 2  ;;  %s578_s15 = scalar_lea.sflag [#allocation5], %s577_s13 }
 0x165   : > { %p830_p1 = pnand %p1469_p3, %p1468_p9 }
 0x167   : > { %p831_p5 = pneg %p830_p1 }
 0x169   : > { %1011 = dma.done.wait (%p831_p5), %s578_s15, 2048  }
 0x16a   : > { %1013 = vsyncadd (%p831_p5), %s578_s15, 4294965248  ;;  %p19_p12 = scmp.ge.s32.totalorder %s1087_s0, 4   ;;  %s1470_s17 = smov %s1020_s18 }
 0x16b   : > { %s1471_s18 = smov %s1024_s19  ;;  %s1472_s19 = smov %s1096_s23 }
 0x16c   : > { %s1473_s20 = smov %s1087_s0  ;;  %21 = sbr.rel (!%p19_p12) target bundleno = 8 (0x8), region = 96 }
 0x171   :  { %583 = vsyncpa [#allocation4], 1 }
 0x172   :  { %585 = vsyncpa [#allocation4 + $0x1], 1 }
 0x173   :  { %586 = vsyncpa [#allocation7], 1 }
 0x174   :  { %587 = vsyncpa [#allocation5], 1 }
 0x175   :  { %589 = vsyncpa [#allocation5 + $0x1], 1 }

// kernel: tpu_custom_call.1
= control target key start
LH: loop header
LB: loop body
LE: loop exit
PB: predicated region body
PF: predicated region fallthrough
CT: control target
= control target key end

     0   :  { %s1449_s0 = inlined_call_operand.<no memory space> [shape: f32[1,1], index: 0, kind: input, shape index: {}]   ;;  %s1450_s1 = inlined_call_operand.hbm [shape: f32[256,128], index: 1, kind: input, shape index: {}]   ;;  %s1451_s2 = inlined_call_operand.hbm [shape: f32[128,128], index: 2, kind: input, shape index: {}]   ;;  %s1452_s3 = inlined_call_operand.hbm [shape: f32[256,128], index: 3, kind: input, shape index: {}]   ;;  %s1453_s4 = inlined_call_operand.hbm [shape: f32[256,128], index: 4, kind: output, shape index: {}]  }
   0x1   :  { %9 = sst [smem:[#allocation2]] %s1449_s0 }
   0x2   :  { %10 = vsyncpa [#allocation4], 0 }
   0x3   :  { %12 = vsyncpa [#allocation4 + $0x1], 0 }
   0x4   :  { %13 = vsyncpa [#allocation7], 0 }
   0x5   :  { %14 = vsyncpa [#allocation5], 0 }
   0x6   :  { %16 = vsyncpa [#allocation5 + $0x1], 0  ;;  %s1066_s17 = smov 0   ;;  %s1068_s18 = smov 0  }
   0x7   :  { %s1070_s19 = smov 0   ;;  %s1072_s20 = smov 0  }
   0x8 LB: > { %s1087_s0 = sadd.s32 1, %s1028_s20   ;;  %s50_s21 = sadd.s32 1, %s1024_s19  ;;  %s1028_s20 = sphi %s1072_s20, %s1473_s20   ;;  %s1024_s19 = sphi %s1070_s19, %s1472_s19   ;;  %s1020_s18 = sphi %s1068_s18, %s1471_s18   ;;  %s1016_s17 = sphi %s1066_s17, %s1470_s17  }
   0x9   : > { %s47_s22 = ssub.s32 %s1028_s20, %s1087_s0  ;;  %p57_p0 = scmp.ne.s32.totalorder %s1024_s19, %s1020_s18 }
   0xa   : > { %p48_p1 = scmp.eq.s32.totalorder %s47_s22, 0  ;;  %p58_p2 = scmp.eq.s32.totalorder %s1028_s20, 0 }
   0xb   : > { %p834_p5 = scmp.lt.s32.totalorder %s1028_s20, 2  ;;  %s176_s24 = sand.u32 1, %s1028_s20  }
   0xc   : > { %s1096_s23 = scalar_select %p48_p1, %s1024_s19, %s50_s21  }
   0xd   : > { %p59_p3 = por %p58_p2, %p57_p0  ;;  %s178_s25 = sand.u32 1, %s1024_s19  }
   0xe   : > { %s1105_s26 = sshll.u32 %s178_s25, 7  ;;  %s685_s27 = sshll.u32 %s1028_s20, 11 }
   0xf   : > { %s1113_s30 = scalar_lea.hbm %s1450_s1, %s685_s27  ;;  %s180_s5 = scalar_lea.vmem [#allocation3], %s1105_s26 }
  0x10   : > { %s187_s6 = sshll.u32 %s180_s5, 4  ;;  %p1116_p6 = pnand %p834_p5, %p59_p3  ;;  %s1120_s6 = int_to_ptr.vmem [resolvable:$true] %s187_s6 }
  0x11   : > { %s1122_s8 = scalar_lea.sflag [#allocation4], %s176_s24  ;;  %s874_s9 = scalar_lea.hbm %s1113_s30, 2048 }
  0x12   : > { %p875_p7 = scmp.ne.s32.totalorder %s1113_s30, %s874_s9  ;;  %p876_p8 = pneg %p1116_p6 }
  0x13   : > { %s879_s12 = scalar_lea.hbm %s1450_s1, 4096  ;;  %p880_p11 = scmp.lt.s32.totalorder %s1113_s30, %s1450_s1 }
  0x14   : > { %p877_p9 = pnand %p876_p8, %p875_p7  ;;  %p881_p12 = scmp.lt.s32.totalorder %s879_s12, %s874_s9 }
  0x16   : > { %p878_p10 = pneg %p877_p9  ;;  %p882_p13 = por %p881_p12, %p880_p11 }
  0x18   : > { %p883_p1 = pnand %p882_p13, %p878_p10 }
  0x1a   : > { %886 = shalt.err (!%p883_p1)
}
  0x1b   : > { %s887_s15 = scalar_lea.vmem %s1120_s6, 2048  ;;  %s1030_s16 = smov [#allocation3]  }
  0x1c   : > { %p888_p2 = scmp.ne.s32.totalorder %s1120_s6, %s887_s15  ;;  %s892_s21 = sshll.u32 %s1030_s16, 4  ;;  %s893_s21 = int_to_ptr.vmem [resolvable:$false] %s892_s21 }
  0x1d   : > { %s894_s22 = scalar_lea.vmem %s893_s21, 4096  ;;  %p895_p7 = scmp.lt.s32.totalorder %s1120_s6, %s893_s21 }
  0x1e   : > { %p890_p3 = pnand %p888_p2, %p876_p8  ;;  %p896_p9 = scmp.lt.s32.totalorder %s894_s22, %s887_s15 }
  0x20   : > { %p891_p5 = pneg %p890_p3  ;;  %p897_p4 = por %p896_p9, %p895_p7 }
  0x22   : > { %p898_p11 = pnand %p897_p4, %p891_p5 }
  0x24   : > { %901 = shalt.err (!%p898_p11)
}
  0x25   : > { %s1031_s24 = smov 128   ;;  %s1032_s25 = smov 8  }
  0x26   : > { %825 = dma.hbm_to_vmem [thread:$0]  (!%p1116_p6), %s1113_s30, 2048, %s1120_s6, %s1122_s8, %s1031_s24, %s1031_s24, %s1032_s25  }
  0x27   : > { %s201_s28 = scalar_lea.vmem [#allocation8], %s1105_s26  ;;  %s1154_s5 = sadd.s32 4294967295, %s1028_s20  }
  0x28   : > { %s208_s29 = sshll.u32 %s201_s28, 4  ;;  %s665_s9 = sadd.s32 4294967294, %s1028_s20   ;;  %s1187_s29 = int_to_ptr.vmem [resolvable:$true] %s208_s29 }
  0x29   : > { %p63_p4 = scmp.ne.s32.totalorder %s1020_s18, %s1016_s17  ;;  %p1454_p10 = scmp.eq.s32.totalorder %s1154_s5, 0 }
  0x2a   : > { %p134_p12 = scmp.eq.s32.totalorder %s1154_s5, 1  ;;  %p140_p13 = scmp.eq.s32.totalorder %s665_s9, 1 }
  0x2b   : > { %p1163_p1 = por %p1454_p10, %p63_p4  ;;  %p666_p2 = scmp.ge.s32.totalorder %s1028_s20, 1 }
  0x2c   : > { %p1171_p3 = por %p134_p12, %p57_p0  ;;  %p1175_p5 = por %p140_p13, %p63_p4 }
  0x2d   : > { %s1458_s10 = scalar_select %p1163_p1, 1, 0 }
  0x2e   : > { %s1459_s26 = scalar_select %p1171_p3, 1, 0 }
  0x2f   : > { %s1460_s30 = scalar_select %p1175_p5, 1, 0 }
  0x30   : > { %p147_p7 = scmp.lt.s32.totalorder %s1028_s20, 3  ;;  %s1185_s12 = scalar_lea.hbm %s1452_s3, %s685_s27 }
  0x31   : > { %s1033_s14 = smov [#allocation6]   ;;  %s902_s16 = scalar_lea.hbm %s1185_s12, 2048 }
  0x32   : > { %p1189_p0 = pnand %p666_p2, %p147_p7  ;;  %s1193_s15 = sshll.u32 %s1033_s14, 4  ;;  %s163_s15 = int_to_ptr.vmem [resolvable:$true] %s1193_s15 }
  0x33   : > { %p903_p11 = scmp.ne.s32.totalorder %s1185_s12, %s902_s16  ;;  %s907_s22 = scalar_lea.hbm %s1452_s3, 4096 }
  0x34   : > { %p908_p13 = scmp.lt.s32.totalorder %s1185_s12, %s1452_s3  ;;  %p909_p2 = scmp.lt.s32.totalorder %s907_s22, %s902_s16 }
  0x35   : > { %p905_p4 = pnand %p903_p11, %p876_p8 }
  0x36   : > { %p910_p7 = por %p909_p2, %p908_p13 }
  0x37   : > { %p906_p12 = pneg %p905_p4 }
  0x39   : > { %p911_p10 = pnand %p910_p7, %p906_p12 }
  0x3b   : > { %914 = shalt.err (!%p911_p10)
}
  0x3c   : > { %s915_s6 = scalar_lea.vmem %s1187_s29, 2048  ;;  %s1034_s11 = smov [#allocation8]  }
  0x3d   : > { %p916_p9 = scmp.ne.s32.totalorder %s1187_s29, %s915_s6  ;;  %s920_s14 = sshll.u32 %s1034_s11, 4  ;;  %s921_s14 = int_to_ptr.vmem [resolvable:$false] %s920_s14 }
  0x3e   : > { %s922_s27 = scalar_lea.vmem %s921_s14, 4096  ;;  %p923_p5 = scmp.lt.s32.totalorder %s1187_s29, %s921_s14 }
  0x3f   : > { %p918_p11 = pnand %p916_p9, %p876_p8  ;;  %p924_p3 = scmp.lt.s32.totalorder %s922_s27, %s915_s6 }
  0x41   : > { %p919_p4 = pneg %p918_p11  ;;  %p925_p1 = por %p924_p3, %p923_p5 }
  0x43   : > { %p926_p13 = pnand %p925_p1, %p919_p4 }
  0x45   : > { %929 = shalt.err (!%p926_p13)
}
  0x46   : > { %828 = dma.hbm_to_vmem [thread:$0]  (!%p1116_p6), %s1185_s12, 2048, %s1187_s29, %s1122_s8, %s1031_s24, %s1031_s24, %s1032_s25  }
  0x47   : > { %p1462_p8 = scmp.eq.s32.totalorder %s1154_s5, 0  ;;  %p1463_p10 = pneg %p1189_p0 }
  0x48   : > { %s941_s16 = scalar_lea.vmem %s163_s15, 2048  ;;  %p949_p2 = scmp.lt.s32.totalorder %s163_s15, %s163_s15 }
  0x49   : > { %p819_p9 = pnand %p1463_p10, %p1462_p8  ;;  %p942_p1 = scmp.ne.s32.totalorder %s163_s15, %s941_s16 }
  0x4a   : > { %p950_p7 = scmp.lt.s32.totalorder %s941_s16, %s941_s16 }
  0x4b   : > { %p932_p3 = pneg %p819_p9 }
  0x4c   : > { %p951_p11 = por %p950_p7, %p949_p2 }
  0x4d   : > { %p944_p5 = pnand %p942_p1, %p932_p3 }
  0x4f   : > { %p945_p12 = pneg %p944_p5 }
  0x51   : > { %p952_p4 = pnand %p951_p11, %p945_p12 }
  0x53   : > { %955 = shalt.err (!%p952_p4)
}
  0x54   : > { %821 = dma.hbm_to_vmem [thread:$0]  (!%p819_p9), %s1451_s2, 2048, %s163_s15, [#allocation7], %s1031_s24, %s1031_s24, %s1032_s25  }
  0x55   : > { %220 = sbr.rel (%p1189_p0) target bundleno = 354 (0x162), region = 36  ;;  %s222_s29 = sand.u32 (!%p1189_p0), 1, %s1154_s5  }
  0x56   : > { %s224_s12 = sand.u32 (!%p1189_p0), 1, %s1020_s18   ;;  %s223_s22 = scalar_lea.sflag (!%p1189_p0), [#allocation4], %s222_s29 }
  0x57   : > { %s1241_s21 = sshll.u32 (!%p1189_p0), %s224_s12, 7  ;;  %p1464_p6 = scmp.ne.s32.totalorder (!%p1189_p0), %s1458_s10, 0 }
  0x58   : > { %s1244_s28 = scalar_lea.vmem (!%p1189_p0), [#allocation3], %s1241_s21 }
  0x5a   : > { %999 = dma.done.wait (%p1464_p6), %s223_s22, 2048  }
  0x5b   : > { %1001 = vsyncadd (%p1464_p6), %s223_s22, 4294965248  ;;  %p1465_p0 = scmp.eq.s32.totalorder %s1154_s5, 0 }
  0x5d   : > { %1003 = dma.done.wait (%p1465_p0), [#allocation7], 2048   ;;  %p1466_p13 = pmov %p1465_p0 }
  0x5e   : > { %s1255_s24 = scalar_lea.vmem [#allocation8], %s1241_s21 }
  0x5f   : > { %1005 = vsyncadd (%p1466_p13), [#allocation7], 4294965248 }
  0x60   : > { %1007 = dma.done.wait (%p1464_p6), %s223_s22, 2048  }
  0x61   : > { %1009 = vsyncadd (%p1464_p6), %s223_s22, 4294965248  ;;  %v370_v0 = vld [vmem:[#allocation6 + $0x78] sm:$0xff]  ;;  %v369_v1 = vld [vmem:[#allocation6 + $0x70] sm:$0xff]  ;;  %s1261_s25 = sld [smem:[#allocation2]]  ;;  %s1369_s13 = scalar_lea.vmem [#allocation9], %s1241_s21 }
  0x62   : > { %720 = vmatprep.subr.mxu0 %v370_v0  ;;  %776 = vmatprep.subr.mxu1 %v370_v0  ;;  %v368_v2 = vld [vmem:[#allocation6 + $0x68] sm:$0xff]  ;;  %v367_v3 = vld [vmem:[#allocation6 + $0x60] sm:$0xff]  ;;  %v366_v4 = vld [vmem:[#allocation6 + $0x58] sm:$0xff]  ;;  %s687_s15 = sshll.u32 %s1154_s5, 11  ;;  %s562_s9 = sshll.u32 %s1369_s13, 4  ;;  %s1400_s9 = int_to_ptr.vmem [resolvable:$true] %s562_s9 }
  0x63   : > { %721 = vmatpush3.msra.mxu0 %v370_v0  ;;  %792 = vmatpush3.msra.mxu1 %v370_v0  ;;  %v365_v5 = vld [vmem:[#allocation6 + $0x50] sm:$0xff]  ;;  %v364_v6 = vld [vmem:[#allocation6 + $0x48] sm:$0xff]  ;;  %v363_v7 = vld [vmem:[#allocation6 + $0x40] sm:$0xff]  ;;  %s1398_s14 = scalar_lea.hbm %s1453_s4, %s687_s15  ;;  %s1408_s5 = scalar_lea.sflag [#allocation5], %s224_s12 }
  0x64   : > { %722 = vmatprep.subr.mxu0 %v369_v1  ;;  %777 = vmatprep.subr.mxu1 %v369_v1  ;;  %v362_v8 = vld [vmem:[#allocation6 + $0x38] sm:$0xff]  ;;  %v361_v9 = vld [vmem:[#allocation6 + $0x30] sm:$0xff]  ;;  %v360_v10 = vld [vmem:[#allocation6 + $0x28] sm:$0xff]  ;;  %s956_s27 = scalar_lea.vmem %s1400_s9, 2048  ;;  %p1467_p10 = scmp.ne.s32.totalorder %s1459_s26, 0 }
  0x65   : > { %723 = vmatpush3.msra.mxu0 %v369_v1  ;;  %793 = vmatpush3.msra.mxu1 %v369_v1  ;;  %v359_v11 = vld [vmem:[#allocation6 + $0x20] sm:$0xff]  ;;  %v358_v14 = vld [vmem:[#allocation6 + $0x18] sm:$0xff]  ;;  %v1273_v16 = vld [vmem:[%s1244_s28 + $0x8] sm:$0xff]  ;;  %p957_p8 = scmp.ne.s32.totalorder %s1400_s9, %s956_s27  ;;  %s1035_s16 = smov [#allocation9]  }
  0x66   : > { %724 = vmatprep.subr.mxu0 %v368_v2  ;;  %778 = vmatprep.subr.mxu1 %v368_v2  ;;  %v1265_v12 = vld [vmem:[%s1244_s28] sm:$0xff]  ;;  %v1276_v17 = vld [vmem:[%s1244_s28 + $0x48] sm:$0xff]  ;;  %v357_v18 = vld [vmem:[#allocation6 + $0x10] sm:$0xff]  ;;  %s960_s7 = sshll.u32 %s1035_s16, 4  ;;  %s961_s7 = int_to_ptr.vmem [resolvable:$false] %s960_s7 }
  0x67   : > { %725 = vmatpush3.msra.mxu0 %v368_v2  ;;  %794 = vmatpush3.msra.mxu1 %v368_v2  ;;  %s273_s10 = smul.f32 0.5, %s1261_s25  ;;  %v1270_v15 = vld [vmem:[%s1244_s28 + $0x40] sm:$0xff]  ;;  %v1281_v20 = vld [vmem:[%s1244_s28 + $0x10] sm:$0xff]  ;;  %v356_v22 = vld [vmem:[#allocation6 + $0x8] sm:$0xff]  ;;  %p958_p9 = pnand %p957_p8, %p1467_p10 }
  0x68   : > { %726 = vmatprep.subr.mxu0 %v367_v3  ;;  %779 = vmatprep.subr.mxu1 %v367_v3  ;;  %v1284_v21 = vld [vmem:[%s1244_s28 + $0x50] sm:$0xff]  ;;  %v307_v23 = vld [vmem:[%s1255_s24] sm:$0xff]  ;;  %v308_v28 = vld [vmem:[%s1255_s24 + $0x8] sm:$0xff]  ;;  %s962_s8 = scalar_lea.vmem %s961_s7, 4096  ;;  %p963_p1 = scmp.lt.s32.totalorder %s1400_s9, %s961_s7 }
  0x69   : > { %727 = vmatpush3.msra.mxu0 %v367_v3  ;;  %795 = vmatpush3.msra.mxu1 %v367_v3  ;;  %v1267_v13 = vstv %s273_s10  ;;  %v355_v26 = vld [vmem:[#allocation6] sm:$0xff]  ;;  %v1296_v30 = vld [vmem:[%s1244_s28 + $0x18] sm:$0xff]  ;;  %v316_v31 = vld [vmem:[%s1255_s24 + $0x48] sm:$0xff]  ;;  %p959_p3 = pneg %p958_p9  ;;  %p964_p5 = scmp.lt.s32.totalorder %s962_s8, %s956_s27 }
  0x6a   : > { %728 = vmatprep.subr.mxu0 %v366_v4  ;;  %780 = vmatprep.subr.mxu1 %v366_v4  ;;  %v291_v19 = vmul.f32 %v1267_v13, %v1265_v12  ;;  %v299_v24 = vmul.f32 %v1267_v13, %v1270_v15  ;;  %v292_v25 = vmul.f32 %v1267_v13, %v1273_v16  ;;  %v315_v27 = vld [vmem:[%s1255_s24 + $0x40] sm:$0xff]  ;;  %v1304_v34 = vld [vmem:[%s1244_s28 + $0x58] sm:$0xff]  ;;  %v309_v37 = vld [vmem:[%s1255_s24 + $0x10] sm:$0xff] }
  0x6b   : > { %729 = vmatpush3.msra.mxu0 %v366_v4  ;;  %796 = vmatpush3.msra.mxu1 %v366_v4  ;;  %v300_v29 = vmul.f32 %v1267_v13, %v1276_v17  ;;  %v293_v32 = vmul.f32 %v1267_v13, %v1281_v20  ;;  %v301_v33 = vmul.f32 %v1267_v13, %v1284_v21  ;;  %v1307_v35 = vld [vmem:[%s1244_s28 + $0x20] sm:$0xff]  ;;  %v317_v38 = vld [vmem:[%s1255_s24 + $0x50] sm:$0xff]  ;;  %v310_v44 = vld [vmem:[%s1255_s24 + $0x18] sm:$0xff]  ;;  %p965_p12 = por %p964_p5, %p963_p1 }
  0x6c   : > { %730 = vmatprep.subr.mxu0 %v365_v5  ;;  %781 = vmatprep.subr.mxu1 %v365_v5  ;;  %v323_v36 = vadd.f32 %v307_v23, %v291_v19  ;;  %v1312_v39 = vld [vmem:[%s1244_s28 + $0x60] sm:$0xff]  ;;  %v331_v40 = vadd.f32 %v315_v27, %v299_v24  ;;  %v324_v41 = vadd.f32 %v308_v28, %v292_v25  ;;  %v1322_v47 = vld [vmem:[%s1244_s28 + $0x28] sm:$0xff]  ;;  %v318_v50 = vld [vmem:[%s1255_s24 + $0x58] sm:$0xff]  ;;  %v340_v24 = vmul.f32 0.5, %v1273_v16 }
  0x6d   : > { %731 = vmatpush3.msra.mxu0 %v365_v5  ;;  %797 = vmatpush3.msra.mxu1 %v365_v5  ;;  %v294_v42 = vmul.f32 %v1267_v13, %v1296_v30  ;;  %v332_v43 = vadd.f32 %v316_v31, %v300_v29  ;;  %v302_v45 = vmul.f32 %v1267_v13, %v1304_v34  ;;  %v311_v51 = vld [vmem:[%s1255_s24 + $0x20] sm:$0xff]  ;;  %v1329_v53 = vld [vmem:[%s1244_s28 + $0x68] sm:$0xff]  ;;  %v1333_v55 = vld [vmem:[%s1244_s28 + $0x30] sm:$0xff]  ;;  %v348_v25 = vmul.f32 0.5, %v1276_v17  ;;  %p966_p2 = pnand %p965_p12, %p959_p3 }
  0x6e   : > { %732 = vmatprep.subr.mxu0 %v364_v6  ;;  %782 = vmatprep.subr.mxu1 %v364_v6  ;;  %v295_v46 = vmul.f32 %v1267_v13, %v1307_v35  ;;  %v325_v48 = vadd.f32 %v309_v37, %v293_v32  ;;  %v333_v49 = vadd.f32 %v317_v38, %v301_v33  ;;  %v319_v54 = vld [vmem:[%s1255_s24 + $0x60] sm:$0xff]  ;;  %v1336_v56 = vld [vmem:[%s1244_s28 + $0x70] sm:$0xff]  ;;  %v312_v61 = vld [vmem:[%s1255_s24 + $0x28] sm:$0xff]  ;;  %v342_v32 = vmul.f32 0.5, %v1296_v30 }
  0x6f   : > { %733 = vmatpush3.msra.mxu0 %v364_v6  ;;  %798 = vmatpush3.msra.mxu1 %v364_v6  ;;  %v303_v52 = vmul.f32 %v1267_v13, %v1312_v39  ;;  %v326_v57 = vadd.f32 %v310_v44, %v294_v42  ;;  %v296_v58 = vmul.f32 %v1267_v13, %v1322_v47  ;;  %v320_v0 = vld [vmem:[%s1255_s24 + $0x68] sm:$0xff]  ;;  %v1349_v3 = vld [vmem:[%s1244_s28 + $0x38] sm:$0xff]  ;;  %v313_v5 = vld [vmem:[%s1255_s24 + $0x30] sm:$0xff]  ;;  %v350_v33 = vmul.f32 0.5, %v1304_v34 }
  0x70   : > { %734 = vmatprep.subr.mxu0 %v363_v7  ;;  %783 = vmatprep.subr.mxu1 %v363_v7  ;;  %v334_v59 = vadd.f32 %v318_v50, %v302_v45  ;;  %v327_v60 = vadd.f32 %v311_v51, %v295_v46  ;;  %v304_v62 = vmul.f32 %v1267_v13, %v1329_v53  ;;  %v1352_v4 = vld [vmem:[%s1244_s28 + $0x78] sm:$0xff]  ;;  %v321_v6 = vld [vmem:[%s1255_s24 + $0x70] sm:$0xff]  ;;  %v341_v16 = vmul.f32 0.5, %v1281_v20 }
  0x71   : > { %735 = vmatpush3.msra.mxu0 %v363_v7  ;;  %799 = vmatpush3.msra.mxu1 %v363_v7  ;;  %v335_v63 = vadd.f32 %v319_v54, %v303_v52  ;;  %v297_v1 = vmul.f32 %v1267_v13, %v1333_v55  ;;  %v305_v2 = vmul.f32 %v1267_v13, %v1336_v56  ;;  %v322_v19 = vld [vmem:[%s1255_s24 + $0x78] sm:$0xff]  ;;  %v349_v17 = vmul.f32 0.5, %v1284_v21 }
  0x72   : > { %736 = vmatprep.subr.mxu0 %v362_v8  ;;  %784 = vmatprep.subr.mxu1 %v362_v8  ;;  %v328_v7 = vadd.f32 %v312_v61, %v296_v58  ;;  %v352_v42 = vmul.f32 0.5, %v1329_v53  ;;  %v343_v45 = vmul.f32 0.5, %v1307_v35  ;;  %v351_v46 = vmul.f32 0.5, %v1312_v39 }
  0x73   : > { %737 = vmatpush3.msra.mxu0 %v362_v8  ;;  %800 = vmatpush3.msra.mxu1 %v362_v8  ;;  %v336_v8 = vadd.f32 %v320_v0, %v304_v62  ;;  %v346_v51 = vmul.f32 0.5, %v1349_v3  ;;  %v354_v52 = vmul.f32 0.5, %v1352_v4  ;;  %v353_v58 = vmul.f32 0.5, %v1336_v56 }
  0x74   : > { %738 = vmatprep.subr.mxu0 %v361_v9  ;;  %785 = vmatprep.subr.mxu1 %v361_v9 }
  0x75   : > { %739 = vmatpush3.msra.mxu0 %v361_v9  ;;  %801 = vmatpush3.msra.mxu1 %v361_v9  ;;  %v298_v9 = vmul.f32 %v1267_v13, %v1349_v3 }
  0x76   : > { %740 = vmatprep.subr.mxu0 %v360_v10  ;;  %786 = vmatprep.subr.mxu1 %v360_v10 }
  0x77   : > { %741 = vmatpush3.msra.mxu0 %v360_v10  ;;  %802 = vmatpush3.msra.mxu1 %v360_v10  ;;  %v306_v10 = vmul.f32 %v1267_v13, %v1352_v4  ;;  %v339_v13 = vmul.f32 0.5, %v1265_v12 }
  0x78   : > { %742 = vmatprep.subr.mxu0 %v359_v11  ;;  %787 = vmatprep.subr.mxu1 %v359_v11 }
  0x79   : > { %743 = vmatpush3.msra.mxu0 %v359_v11  ;;  %803 = vmatpush3.msra.mxu1 %v359_v11  ;;  %v329_v11 = vadd.f32 %v313_v5, %v297_v1  ;;  %v338_v23 = vadd.f32 %v322_v19, %v306_v10 }
  0x7a   : > { %744 = vmatprep.subr.mxu0 %v358_v14  ;;  %788 = vmatprep.subr.mxu1 %v358_v14 }
  0x7b   : > { %745 = vmatpush3.msra.mxu0 %v358_v14  ;;  %804 = vmatpush3.msra.mxu1 %v358_v14  ;;  %v337_v14 = vadd.f32 %v321_v6, %v305_v2 }
  0x7c   : > { %746 = vmatprep.subr.mxu0 %v357_v18  ;;  %789 = vmatprep.subr.mxu1 %v357_v18 }
  0x7d   : > { %747 = vmatpush3.msra.mxu0 %v357_v18  ;;  %805 = vmatpush3.msra.mxu1 %v357_v18  ;;  %v314_v18 = vld [vmem:[%s1255_s24 + $0x38] sm:$0xff] }
  0x7e   : > { %748 = vmatprep.subr.mxu0 %v356_v22  ;;  %790 = vmatprep.subr.mxu1 %v356_v22 }
  0x7f   : > { %749 = vmatpush3.msra.mxu0 %v356_v22  ;;  %806 = vmatpush3.msra.mxu1 %v356_v22  ;;  %v330_v22 = vadd.f32 %v314_v18, %v298_v9 }
  0x80   : > { %750 = vmatprep.subr.mxu0 %v355_v26  ;;  %791 = vmatprep.subr.mxu1 %v355_v26 }
  0x81   : > { %751 = vmatpush3.msra.mxu0 %v355_v26  ;;  %807 = vmatpush3.msra.mxu1 %v355_v26  ;;  %v347_v26 = vmul.f32 0.5, %v1270_v15 }
  0x82   : > { %752 = vmatprep.mubr.f32.mxu0 %v323_v36  ;;  %764 = vmatprep.mubr.f32.mxu1 %v331_v40 }
  0x83   : > { %753 = vmatmul.mubr.f32.vlgmr.msra.gmra.mxu0 %v324_v41  ;;  %765 = vmatmul.mubr.f32.vlgmr.msra.gmra.mxu1 %v332_v43  ;;  %v344_v41 = vmul.f32 0.5, %v1322_v47 }
  0x84   : > { %755 = vmatprep.mubr.f32.mxu0 %v325_v48  ;;  %767 = vmatprep.mubr.f32.mxu1 %v333_v49 }
  0x87   : > { %756 = vmatmul.mubr.f32.gmra.mxu0 %v326_v57  ;;  %768 = vmatmul.mubr.f32.gmra.mxu1 %v334_v59  ;;  %v345_v57 = vmul.f32 0.5, %v1333_v55 }
  0x88   : > { %758 = vmatprep.mubr.f32.mxu0 %v327_v60  ;;  %770 = vmatprep.mubr.f32.mxu1 %v335_v63 }
  0x8b   : > { %759 = vmatmul.mubr.f32.gmra.mxu0 %v328_v7  ;;  %771 = vmatmul.mubr.f32.gmra.mxu1 %v336_v8 }
  0x8c   : > { %761 = vmatprep.mubr.f32.mxu0 %v329_v11  ;;  %773 = vmatprep.mubr.f32.mxu1 %v337_v14 }
  0x8f   : > { %762 = vmatmul.mubr.f32.gmra.mxu0 %v330_v22  ;;  %774 = vmatmul.mubr.f32.gmra.mxu1 %v338_v23 }
 0x143   : > { %v754_v27 = vpop.f32.mrf.mxu0  ;;  %v766_v28 = vpop.f32.mrf.mxu1 }
 0x144   : > { %v517_v29 = vadd.f32 %v754_v27, %v340_v24  ;;  %v525_v31 = vadd.f32 %v766_v28, %v348_v25 }
 0x145   : > { %v437_v36 = vpop.f32.mrf.mxu0  ;;  %v477_v37 = vpop.f32.mrf.mxu1 }
 0x146   : > { %533 = vst [vmem:[%s1369_s13 + $0x8] sm:$0xff] %v517_v29  ;;  %541 = vst [vmem:[%s1369_s13 + $0x48] sm:$0xff] %v525_v31  ;;  %v516_v12 = vadd.f32 %v437_v36, %v339_v13  ;;  %v524_v15 = vadd.f32 %v477_v37, %v347_v26 }
 0x147   : > { %v757_v30 = vpop.f32.mrf.mxu0  ;;  %v769_v34 = vpop.f32.mrf.mxu1 }
 0x148   : > { %532 = vst [vmem:[%s1369_s13] sm:$0xff] %v516_v12  ;;  %540 = vst [vmem:[%s1369_s13 + $0x40] sm:$0xff] %v524_v15  ;;  %v519_v38 = vadd.f32 %v757_v30, %v342_v32  ;;  %v527_v40 = vadd.f32 %v769_v34, %v350_v33 }
 0x149   : > { %v447_v43 = vpop.f32.mrf.mxu0  ;;  %v487_v44 = vpop.f32.mrf.mxu1 }
 0x14a   : > { %535 = vst [vmem:[%s1369_s13 + $0x18] sm:$0xff] %v519_v38  ;;  %543 = vst [vmem:[%s1369_s13 + $0x58] sm:$0xff] %v527_v40  ;;  %v518_v20 = vadd.f32 %v447_v43, %v341_v16  ;;  %v526_v21 = vadd.f32 %v487_v44, %v349_v17 }
 0x14b   : > { %v760_v48 = vpop.f32.mrf.mxu0  ;;  %v772_v49 = vpop.f32.mrf.mxu1 }
 0x14c   : > { %534 = vst [vmem:[%s1369_s13 + $0x10] sm:$0xff] %v518_v20  ;;  %542 = vst [vmem:[%s1369_s13 + $0x50] sm:$0xff] %v526_v21  ;;  %v521_v47 = vadd.f32 %v760_v48, %v344_v41  ;;  %v529_v50 = vadd.f32 %v772_v49, %v352_v42 }
 0x14d   : > { %v457_v53 = vpop.f32.mrf.mxu0  ;;  %v497_v54 = vpop.f32.mrf.mxu1 }
 0x14e   : > { %537 = vst [vmem:[%s1369_s13 + $0x28] sm:$0xff] %v521_v47  ;;  %545 = vst [vmem:[%s1369_s13 + $0x68] sm:$0xff] %v529_v50  ;;  %v520_v35 = vadd.f32 %v457_v53, %v343_v45  ;;  %v528_v39 = vadd.f32 %v497_v54, %v351_v46 }
 0x14f   : > { %v763_v59 = vpop.f32.mrf.mxu0  ;;  %v775_v60 = vpop.f32.mrf.mxu1 }
 0x150   : > { %536 = vst [vmem:[%s1369_s13 + $0x20] sm:$0xff] %v520_v35  ;;  %544 = vst [vmem:[%s1369_s13 + $0x60] sm:$0xff] %v528_v39  ;;  %v523_v61 = vadd.f32 %v763_v59, %v346_v51  ;;  %v531_v62 = vadd.f32 %v775_v60, %v354_v52 }
 0x151   : > { %v467_v63 = vpop.f32.mrf.mxu0  ;;  %v507_v0 = vpop.f32.mrf.mxu1 }
 0x152   : > { %539 = vst [vmem:[%s1369_s13 + $0x38] sm:$0xff] %v523_v61  ;;  %547 = vst [vmem:[%s1369_s13 + $0x78] sm:$0xff] %v531_v62  ;;  %v522_v55 = vadd.f32 %v467_v63, %v345_v57  ;;  %v530_v56 = vadd.f32 %v507_v0, %v353_v58 }
 0x154   : > { %538 = vst [vmem:[%s1369_s13 + $0x30] sm:$0xff] %v522_v55  ;;  %546 = vst [vmem:[%s1369_s13 + $0x70] sm:$0xff] %v530_v56 }
 0x155   : > { %969 = shalt.err (!%p966_p2)
}
 0x156   : > { %s970_s29 = scalar_lea.hbm %s1398_s14, 2048  ;;  %s974_s22 = scalar_lea.hbm %s1453_s4, 4096 }
 0x157   : > { %p971_p7 = scmp.ne.s32.totalorder %s1398_s14, %s970_s29  ;;  %p975_p6 = scmp.lt.s32.totalorder %s1398_s14, %s1453_s4 }
 0x158   : > { %p976_p0 = scmp.lt.s32.totalorder %s974_s22, %s970_s29 }
 0x159   : > { %p972_p11 = pnand %p971_p7, %p1467_p10 }
 0x15a   : > { %p977_p13 = por %p976_p0, %p975_p6 }
 0x15b   : > { %p973_p4 = pneg %p972_p11 }
 0x15d   : > { %p978_p8 = pnand %p977_p13, %p973_p4 }
 0x15f   : > { %981 = shalt.err (!%p978_p8)
}
 0x160   : > { %s1036_s25 = smov 128   ;;  %s1037_s10 = smov 8  }
 0x161   : > { %816 = dma.vmem_to_hbm [thread:$0]  (%p1467_p10), %s1400_s9, 2048, %s1398_s14, %s1408_s5, %s1036_s25, %s1036_s25, %s1037_s10  }
 0x162 PF: > { %s577_s13 = sand.u32 1, %s1016_s17   ;;  %p1468_p9 = scmp.ne.s32.totalorder %s1460_s30, 0 }
 0x163   : > { %p1469_p3 = scmp.ge.s32.totalorder %s1028_s20, 2  ;;  %s578_s15 = scalar_lea.sflag [#allocation5], %s577_s13 }
 0x165   : > { %p830_p1 = pnand %p1469_p3, %p1468_p9 }
 0x167   : > { %p831_p5 = pneg %p830_p1 }
 0x169   : > { %1011 = dma.done.wait (%p831_p5), %s578_s15, 2048  }
 0x16a   : > { %1013 = vsyncadd (%p831_p5), %s578_s15, 4294965248  ;;  %p19_p12 = scmp.ge.s32.totalorder %s1087_s0, 4   ;;  %s1470_s17 = smov %s1020_s18 }
 0x16b   : > { %s1471_s18 = smov %s1024_s19  ;;  %s1472_s19 = smov %s1096_s23 }
 0x16c   : > { %s1473_s20 = smov %s1087_s0  ;;  %21 = sbr.rel (!%p19_p12) target bundleno = 8 (0x8), region = 96 }
 0x171   :  { %583 = vsyncpa [#allocation4], 1 }
 0x172   :  { %585 = vsyncpa [#allocation4 + $0x1], 1 }
 0x173   :  { %586 = vsyncpa [#allocation7], 1 }
 0x174   :  { %587 = vsyncpa [#allocation5], 1 }
 0x175   :  { %589 = vsyncpa [#allocation5 + $0x1], 1 }

</bundles_post_ra>
